<compile_context>
chip_gen: v5e
topology: v5e:2x2
jax: 0.10.0
libtpu: 0.0.40
codegen_flags: <defaults>
</compile_context>

<pallas_src>
import jax
import jax.numpy as jnp
from jax import lax
from jax.experimental import pallas as pl
from jax.experimental.pallas import tpu as pltpu

EPS = 1e-8


def _l2norm(x):
    # matches torch: sqrt(sum(x^2)) + eps, then divide
    norm = jnp.sqrt(jnp.sum(x * x, axis=-1, keepdims=True)) + EPS
    return x / norm


def _pick_chunk(T, B, target):
    """Largest Tc <= target with T % Tc == 0 and (Tc*B) % 8 == 0 (sublane rule)."""
    for tc in range(min(target, T), 0, -1):
        if T % tc == 0 and (tc * B) % 8 == 0:
            return tc
    return T  # full-array block is always a legal BlockSpec


def _make_kernel(T, B, D, H, Tc):
    """Build the chunked GRU-encoder kernel (static dims captured by closure)."""

    def kernel(x_ref, wih_ref, whh_ref, bih_ref, bhh_ref, mask_ref,
               cap_emb_ref, cap_mean_ref,
               h_ref, acc_ref, gx_ref):
        # x_ref:    (Tc*B, D)   time-major flattened embeddings for this chunk
        # wih_ref:  (D, 3H)     input->gates weight (pre-transposed, resident)
        # whh_ref:  (H, 3H)     hidden->gates weight (pre-transposed, resident)
        # bih_ref:  (1, 3H), bhh_ref: (1, 3H)
        # mask_ref: (Tc*B, 1)   1.0 where t < lengths[b], else 0.0
        # cap_emb_ref:  (Tc*B, H)  out (normalized per-timestep embeddings)
        # cap_mean_ref: (B, H)     out (written on the last chunk)
        # h_ref:   (B, H)  scratch — GRU hidden-state carry across chunks
        # acc_ref: (B, H)  scratch — running sum of normalized outputs
        # gx_ref:  (Tc*B, 3H) scratch — hoisted input-gate projections
        i = pl.program_id(0)

        @pl.when(i == 0)
        def _init():
            h_ref[...] = jnp.zeros_like(h_ref)
            acc_ref[...] = jnp.zeros_like(acc_ref)

        # ---- Phase 1: hoisted input projection (one batched MXU matmul) ----
        gx_ref[...] = jnp.dot(x_ref[...], wih_ref[...],
                              preferred_element_type=jnp.float32) + bih_ref[...]

        whh = whh_ref[...]
        bhh = bhh_ref[...]

        # ---- Phase 2: serial GRU recurrence (only h @ W_hh on the critical path) ----
        def step(tt, h):
            row = pl.multiple_of(tt * B, B)
            gx = gx_ref[pl.ds(row, B), :]                                  # (B, 3H)
            gh = jnp.dot(h, whh, preferred_element_type=jnp.float32) + bhh  # (B, 3H)
            r = jax.nn.sigmoid(gx[:, :H] + gh[:, :H])
            z = jax.nn.sigmoid(gx[:, H:2 * H] + gh[:, H:2 * H])
            n = jnp.tanh(gx[:, 2 * H:] + r * gh[:, 2 * H:])
            h_new = (1.0 - z) * n + z * h
            cap_emb_ref[pl.ds(row, B), :] = h_new                          # raw hidden
            return h_new

        h_ref[...] = lax.fori_loop(0, Tc, step, h_ref[...], unroll=True)

        # ---- Phase 3: vectorized epilogue (mask + l2norm + accumulate) ----
        raw = cap_emb_ref[...]                     # (Tc*B, H)
        out = raw * mask_ref[...]                  # zero out padded timesteps
        norm = jnp.sqrt(jnp.sum(out * out, axis=-1, keepdims=True)) + EPS
        # approx=True would move this onto the EUP; kept exact to preserve the
        # strict f32 parity with the reference.
        out_norm = out * pl.reciprocal(norm, approx=False)
        cap_emb_ref[...] = out_norm

        # per-batch sum over the chunk's timesteps (static sublane slices)
        chunk_sum = out_norm[0:B, :]
        for tt in range(1, Tc):
            chunk_sum = chunk_sum + out_norm[tt * B:(tt + 1) * B, :]
        acc_ref[...] += chunk_sum

        @pl.when(i == pl.num_programs(0) - 1)
        def _finalize():
            mean = acc_ref[...] * (1.0 / float(T))   # mean over T incl. zero pads
            mnorm = jnp.sqrt(jnp.sum(mean * mean, axis=-1, keepdims=True)) + EPS
            cap_mean_ref[...] = mean * pl.reciprocal(mnorm, approx=False)

    return kernel


def encoder_word_forward(token_ids, lengths, params, *, chunk_t=4):
    """token_ids: (B, T) int32, lengths: (B,) int32.
    Returns (cap_emb (B, T, H), cap_emb_mean (B, H))."""
    embed_w = params["embed"]                            # (V, D)
    w_ih, w_hh = params["w_ih"], params["w_hh"]          # (3H, D), (3H, H)
    b_ih, b_hh = params["b_ih"], params["b_hh"]          # (3H,), (3H,)

    B, T = token_ids.shape
    D = embed_w.shape[1]
    H = w_hh.shape[1]
    Tc = _pick_chunk(T, B, chunk_t)                      # demo: Tc=4 -> grid=(2,)
    n_chunks = T // Tc

    # Gather embeddings directly in time-major order, then flatten: (T*B, D).
    x2d = jnp.take(embed_w, token_ids.T, axis=0).astype(jnp.float32).reshape(T * B, D)
    # dropout(0.1): identity in eval mode
    # TODO(synk): training-mode dropout (pltpu.prng_*) not wired in; inference semantics used.

    wih_t = jnp.transpose(w_ih).astype(jnp.float32)      # (D, 3H)
    whh_t = jnp.transpose(w_hh).astype(jnp.float32)      # (H, 3H)
    bih2 = b_ih.reshape(1, 3 * H).astype(jnp.float32)
    bhh2 = b_hh.reshape(1, 3 * H).astype(jnp.float32)

    # Validity mask, time-major flattened: row t*B + b == 1.0 iff t < lengths[b].
    mask2d = (jnp.arange(T, dtype=jnp.int32)[:, None]
              < lengths.astype(jnp.int32)[None, :]).astype(jnp.float32).reshape(T * B, 1)

    kernel = _make_kernel(T, B, D, H, Tc)

    cap_emb2d, cap_mean = pl.pallas_call(
        kernel,
        grid=(n_chunks,),
        out_shape=(jax.ShapeDtypeStruct((T * B, H), jnp.float32),
                   jax.ShapeDtypeStruct((B, H), jnp.float32)),
        in_specs=[
            pl.BlockSpec((Tc * B, D), lambda i: (i, 0)),       # x chunk (pipelined)
            pl.BlockSpec((D, 3 * H), lambda i: (0, 0)),        # W_ih^T (resident)
            pl.BlockSpec((H, 3 * H), lambda i: (0, 0)),        # W_hh^T (resident)
            pl.BlockSpec((1, 3 * H), lambda i: (0, 0)),        # b_ih
            pl.BlockSpec((1, 3 * H), lambda i: (0, 0)),        # b_hh
            pl.BlockSpec((Tc * B, 1), lambda i: (i, 0)),       # validity mask chunk
        ],
        out_specs=(
            pl.BlockSpec((Tc * B, H), lambda i: (i, 0)),       # cap_emb chunk
            pl.BlockSpec((B, H), lambda i: (0, 0)),            # cap_mean (accumulator)
        ),
        scratch_shapes=[
            pltpu.VMEM((B, H), jnp.float32),            # GRU hidden-state carry
            pltpu.VMEM((B, H), jnp.float32),            # sum of normalized outputs
            pltpu.VMEM((Tc * B, 3 * H), jnp.float32),   # hoisted gate projections
        ],
        compiler_params=pltpu.CompilerParams(
            dimension_semantics=("arbitrary",),
            vmem_limit_bytes=32 * 1024 * 1024,
        ),
    )(x2d, wih_t, whh_t, bih2, bhh2, mask2d)

    # (T*B, H) time-major -> (B, T, H) batch-first.
    # TODO(synk): could be emitted directly from the kernel as (B, Tc, H) blocks
    # (requires Tc % 8 == 0 + in-kernel relayout); kept wrapper-side for robustness.
    cap_emb = jnp.transpose(cap_emb2d.reshape(T, B, H), (1, 0, 2))
    return cap_emb, cap_mean


def reference_forward(token_ids, lengths, params):
    """Pure-JAX reference of the same semantics (for verification)."""
    x = jnp.take(params["embed"], token_ids, axis=0).astype(jnp.float32)
    B, T, _ = x.shape
    w_ih, w_hh = params["w_ih"], params["w_hh"]
    b_ih, b_hh = params["b_ih"], params["b_hh"]
    H = w_hh.shape[1]
    h = jnp.zeros((B, H), jnp.float32)
    outs = []
    for t in range(T):
        x_t = x[:, t, :]
        gx = x_t @ w_ih.T + b_ih
        gh = h @ w_hh.T + b_hh
        r = jax.nn.sigmoid(gx[:, :H] + gh[:, :H])
        z = jax.nn.sigmoid(gx[:, H:2 * H] + gh[:, H:2 * H])
        n = jnp.tanh(gx[:, 2 * H:] + r * gh[:, 2 * H:])
        h_new = (1.0 - z) * n + z * h
        valid = (lengths > t)[:, None]
        h = jnp.where(valid, h_new, h)
        outs.append(jnp.where(valid, h_new, 0.0))
    cap = _l2norm(jnp.stack(outs, axis=1))
    mean = jnp.mean(cap, axis=1)
    return cap, _l2norm(mean)


if __name__ == "__main__":
    # small shapes consistent with the module
    V, D, H = 50, 32, 32          # vocab_size, word_dim, embed_size
    B, T = 2, 8                   # batch, max sequence length
    key = jax.random.PRNGKey(0)
    k0, k1, k2, k3, k4, k5 = jax.random.split(key, 6)

    params = {
        "embed": 0.1 * jax.random.normal(k0, (V, D), jnp.float32),
        "w_ih": 0.1 * jax.random.normal(k1, (3 * H, D), jnp.float32),
        "w_hh": 0.1 * jax.random.normal(k2, (3 * H, H), jnp.float32),
        "b_ih": 0.1 * jax.random.normal(k3, (3 * H,), jnp.float32),
        "b_hh": 0.1 * jax.random.normal(k4, (3 * H,), jnp.float32),
    }

    token_ids = jax.random.randint(k5, (B, T), 0, V, dtype=jnp.int32)
    lengths = jnp.array([T, 5], dtype=jnp.int32)   # max(lengths) == T

    cap_emb, cap_mean = encoder_word_forward(token_ids, lengths, params)
    cap_emb = jax.block_until_ready(cap_emb)
    cap_mean = jax.block_until_ready(cap_mean)

    ref_emb, ref_mean = reference_forward(token_ids, lengths, params)
    assert cap_emb.shape == (B, T, H) and cap_mean.shape == (B, H)
    assert jnp.allclose(cap_emb, ref_emb, rtol=1e-4, atol=1e-5)
    assert jnp.allclose(cap_mean, ref_mean, rtol=1e-4, atol=1e-5)

    print("KERNEL_OK")
</pallas_src>

<mosaic_0001>
module attributes {stable_mosaic.version = 11 : i64} {
  func.func @kernel(%arg0: i32, %arg1: memref<8x32xf32, #tpu.memory_space<vmem>>, %arg2: memref<32x96xf32, #tpu.memory_space<vmem>>, %arg3: memref<32x96xf32, #tpu.memory_space<vmem>>, %arg4: memref<1x96xf32, #tpu.memory_space<vmem>>, %arg5: memref<1x96xf32, #tpu.memory_space<vmem>>, %arg6: memref<8x1xf32, #tpu.memory_space<vmem>>, %arg7: memref<8x32xf32, #tpu.memory_space<vmem>>, %arg8: memref<2x32xf32, #tpu.memory_space<vmem>>, %arg9: memref<2x32xf32, #tpu.memory_space<vmem>>, %arg10: memref<2x32xf32, #tpu.memory_space<vmem>>, %arg11: memref<8x96xf32, #tpu.memory_space<vmem>>) attributes {dimension_semantics = [#tpu.dimension_semantics<arbitrary>], iteration_bounds = array<i64: 2>, scalar_prefetch = 0 : i64, scratch_operands = 3 : i64, tpu.core_type = #tpu.core_type<tc>, window_params = [{transform_indices = @transform_0, window_bounds = array<i64: 8, 32>}, {pipeline_mode = #tpu.pipeline_mode<synchronous>, transform_indices = @transform_1, window_bounds = array<i64: 32, 96>}, {pipeline_mode = #tpu.pipeline_mode<synchronous>, transform_indices = @transform_2, window_bounds = array<i64: 32, 96>}, {pipeline_mode = #tpu.pipeline_mode<synchronous>, transform_indices = @transform_3, window_bounds = array<i64: 1, 96>}, {pipeline_mode = #tpu.pipeline_mode<synchronous>, transform_indices = @transform_4, window_bounds = array<i64: 1, 96>}, {transform_indices = @transform_5, window_bounds = array<i64: 8, 1>}, {transform_indices = @transform_6, window_bounds = array<i64: 8, 32>}, {pipeline_mode = #tpu.pipeline_mode<synchronous>, transform_indices = @transform_7, window_bounds = array<i64: 2, 32>}]} {
    %c0_i32 = arith.constant 0 : i32
    %0 = arith.cmpi eq, %arg0, %c0_i32 : i32
    %1 = arith.extui %0 : i1 to i32
    %c0_i32_0 = arith.constant 0 : i32
    %2 = arith.cmpi ne, %1, %c0_i32_0 : i32
    scf.if %2 {
      %cst_59 = arith.constant 0.000000e+00 : f32
      %181 = vector.broadcast %cst_59 : f32 to vector<2x32xf32>
      %c0_60 = arith.constant 0 : index
      %c0_61 = arith.constant 0 : index
      %182 = vector.load %arg9[%c0_60, %c0_61] : memref<2x32xf32, #tpu.memory_space<vmem>>, vector<2x32xf32>
      tpu.vector_store %arg9[%c0_60, %c0_61], %181 {strides = array<i32>} : memref<2x32xf32, #tpu.memory_space<vmem>>, vector<2x32xf32>,
      %cst_62 = arith.constant 0.000000e+00 : f32
      %183 = vector.broadcast %cst_62 : f32 to vector<2x32xf32>
      %c0_63 = arith.constant 0 : index
      %c0_64 = arith.constant 0 : index
      %184 = vector.load %arg10[%c0_63, %c0_64] : memref<2x32xf32, #tpu.memory_space<vmem>>, vector<2x32xf32>
      tpu.vector_store %arg10[%c0_63, %c0_64], %183 {strides = array<i32>} : memref<2x32xf32, #tpu.memory_space<vmem>>, vector<2x32xf32>,
    } else {
    }
    %c0 = arith.constant 0 : index
    %c0_1 = arith.constant 0 : index
    %3 = vector.load %arg1[%c0, %c0_1] : memref<8x32xf32, #tpu.memory_space<vmem>>, vector<8x32xf32>
    %c0_2 = arith.constant 0 : index
    %c0_3 = arith.constant 0 : index
    %4 = vector.load %arg2[%c0_2, %c0_3] : memref<32x96xf32, #tpu.memory_space<vmem>>, vector<32x96xf32>
    %cst = arith.constant dense<0.000000e+00> : vector<8x96xf32>
    %5 = tpu.matmul %3, %4, %cst {dimension_numbers = #tpu.dot_dimension_numbers<[1], [0], [0], [1], [0, 0, 1, 1], [], []>} : vector<8x32xf32>, vector<32x96xf32>, vector<8x96xf32> -> vector<8x96xf32>
    %c0_4 = arith.constant 0 : index
    %c0_5 = arith.constant 0 : index
    %6 = vector.load %arg4[%c0_4, %c0_5] : memref<1x96xf32, #tpu.memory_space<vmem>>, vector<1x96xf32>
    %7 = vector.broadcast %6 : vector<1x96xf32> to vector<8x96xf32>
    %8 = arith.addf %5, %7 : vector<8x96xf32>
    %c0_6 = arith.constant 0 : index
    %c0_7 = arith.constant 0 : index
    %9 = vector.load %arg11[%c0_6, %c0_7] : memref<8x96xf32, #tpu.memory_space<vmem>>, vector<8x96xf32>
    tpu.vector_store %arg11[%c0_6, %c0_7], %8 {strides = array<i32>} : memref<8x96xf32, #tpu.memory_space<vmem>>, vector<8x96xf32>,
    %c0_8 = arith.constant 0 : index
    %c0_9 = arith.constant 0 : index
    %10 = vector.load %arg3[%c0_8, %c0_9] : memref<32x96xf32, #tpu.memory_space<vmem>>, vector<32x96xf32>
    %c0_10 = arith.constant 0 : index
    %c0_11 = arith.constant 0 : index
    %11 = vector.load %arg5[%c0_10, %c0_11] : memref<1x96xf32, #tpu.memory_space<vmem>>, vector<1x96xf32>
    %c0_12 = arith.constant 0 : index
    %c0_13 = arith.constant 0 : index
    %12 = vector.load %arg9[%c0_12, %c0_13] : memref<2x32xf32, #tpu.memory_space<vmem>>, vector<2x32xf32>
    %c0_i32_14 = arith.constant 0 : i32
    %c2_i32 = arith.constant 2 : i32
    %13 = arith.muli %c0_i32_14, %c2_i32 : i32
    %14 = tpu.assume_multiple %13, 2 : i32
    %15 = arith.index_cast %14 : i32 to index
    %c0_15 = arith.constant 0 : index
    %16 = vector.load %arg11[%15, %c0_15] : memref<8x96xf32, #tpu.memory_space<vmem>>, vector<2x96xf32>
    %cst_16 = arith.constant dense<0.000000e+00> : vector<2x96xf32>
    %17 = tpu.matmul %12, %10, %cst_16 {dimension_numbers = #tpu.dot_dimension_numbers<[1], [0], [0], [1], [0, 0, 1, 1], [], []>} : vector<2x32xf32>, vector<32x96xf32>, vector<2x96xf32> -> vector<2x96xf32>
    %18 = vector.broadcast %11 : vector<1x96xf32> to vector<2x96xf32>
    %19 = arith.addf %17, %18 : vector<2x96xf32>
    %20 = vector.extract_strided_slice %16 {offsets = [0, 0], sizes = [2, 32], strides = [1, 1]} : vector<2x96xf32> to vector<2x32xf32>
    %21 = vector.extract_strided_slice %19 {offsets = [0, 0], sizes = [2, 32], strides = [1, 1]} : vector<2x96xf32> to vector<2x32xf32>
    %22 = arith.addf %20, %21 : vector<2x32xf32>
    %23 = arith.negf %22 : vector<2x32xf32>
    %24 = math.exp %23 : vector<2x32xf32>
    %cst_17 = arith.constant 1.000000e+00 : f32
    %25 = vector.broadcast %cst_17 : f32 to vector<2x32xf32>
    %26 = arith.addf %25, %24 : vector<2x32xf32>
    %27 = arith.divf %25, %26 : vector<2x32xf32>
    %28 = vector.extract_strided_slice %16 {offsets = [0, 32], sizes = [2, 32], strides = [1, 1]} : vector<2x96xf32> to vector<2x32xf32>
    %29 = vector.extract_strided_slice %19 {offsets = [0, 32], sizes = [2, 32], strides = [1, 1]} : vector<2x96xf32> to vector<2x32xf32>
    %30 = arith.addf %28, %29 : vector<2x32xf32>
    %31 = arith.negf %30 : vector<2x32xf32>
    %32 = math.exp %31 : vector<2x32xf32>
    %cst_18 = arith.constant 1.000000e+00 : f32
    %33 = vector.broadcast %cst_18 : f32 to vector<2x32xf32>
    %34 = arith.addf %33, %32 : vector<2x32xf32>
    %35 = arith.divf %33, %34 : vector<2x32xf32>
    %36 = vector.extract_strided_slice %16 {offsets = [0, 64], sizes = [2, 32], strides = [1, 1]} : vector<2x96xf32> to vector<2x32xf32>
    %37 = vector.extract_strided_slice %19 {offsets = [0, 64], sizes = [2, 32], strides = [1, 1]} : vector<2x96xf32> to vector<2x32xf32>
    %38 = arith.mulf %27, %37 : vector<2x32xf32>
    %39 = arith.addf %36, %38 : vector<2x32xf32>
    %40 = math.tanh %39 : vector<2x32xf32>
    %cst_19 = arith.constant 1.000000e+00 : f32
    %41 = vector.broadcast %cst_19 : f32 to vector<2x32xf32>
    %42 = arith.subf %41, %35 : vector<2x32xf32>
    %43 = arith.mulf %42, %40 : vector<2x32xf32>
    %44 = arith.mulf %35, %12 : vector<2x32xf32>
    %45 = arith.addf %43, %44 : vector<2x32xf32>
    %46 = arith.index_cast %14 : i32 to index
    %c0_20 = arith.constant 0 : index
    %47 = vector.load %arg7[%46, %c0_20] : memref<8x32xf32, #tpu.memory_space<vmem>>, vector<2x32xf32>
    tpu.vector_store %arg7[%46, %c0_20], %45 {strides = array<i32>} : memref<8x32xf32, #tpu.memory_space<vmem>>, vector<2x32xf32>,
    %c1_i32 = arith.constant 1 : i32
    %c2_i32_21 = arith.constant 2 : i32
    %48 = arith.muli %c1_i32, %c2_i32_21 : i32
    %49 = tpu.assume_multiple %48, 2 : i32
    %50 = arith.index_cast %49 : i32 to index
    %c0_22 = arith.constant 0 : index
    %51 = vector.load %arg11[%50, %c0_22] : memref<8x96xf32, #tpu.memory_space<vmem>>, vector<2x96xf32>
    %cst_23 = arith.constant dense<0.000000e+00> : vector<2x96xf32>
    %52 = tpu.matmul %45, %10, %cst_23 {dimension_numbers = #tpu.dot_dimension_numbers<[1], [0], [0], [1], [0, 0, 1, 1], [], []>} : vector<2x32xf32>, vector<32x96xf32>, vector<2x96xf32> -> vector<2x96xf32>
    %53 = vector.broadcast %11 : vector<1x96xf32> to vector<2x96xf32>
    %54 = arith.addf %52, %53 : vector<2x96xf32>
    %55 = vector.extract_strided_slice %51 {offsets = [0, 0], sizes = [2, 32], strides = [1, 1]} : vector<2x96xf32> to vector<2x32xf32>
    %56 = vector.extract_strided_slice %54 {offsets = [0, 0], sizes = [2, 32], strides = [1, 1]} : vector<2x96xf32> to vector<2x32xf32>
    %57 = arith.addf %55, %56 : vector<2x32xf32>
    %58 = arith.negf %57 : vector<2x32xf32>
    %59 = math.exp %58 : vector<2x32xf32>
    %cst_24 = arith.constant 1.000000e+00 : f32
    %60 = vector.broadcast %cst_24 : f32 to vector<2x32xf32>
    %61 = arith.addf %60, %59 : vector<2x32xf32>
    %62 = arith.divf %60, %61 : vector<2x32xf32>
    %63 = vector.extract_strided_slice %51 {offsets = [0, 32], sizes = [2, 32], strides = [1, 1]} : vector<2x96xf32> to vector<2x32xf32>
    %64 = vector.extract_strided_slice %54 {offsets = [0, 32], sizes = [2, 32], strides = [1, 1]} : vector<2x96xf32> to vector<2x32xf32>
    %65 = arith.addf %63, %64 : vector<2x32xf32>
    %66 = arith.negf %65 : vector<2x32xf32>
    %67 = math.exp %66 : vector<2x32xf32>
    %cst_25 = arith.constant 1.000000e+00 : f32
    %68 = vector.broadcast %cst_25 : f32 to vector<2x32xf32>
    %69 = arith.addf %68, %67 : vector<2x32xf32>
    %70 = arith.divf %68, %69 : vector<2x32xf32>
    %71 = vector.extract_strided_slice %51 {offsets = [0, 64], sizes = [2, 32], strides = [1, 1]} : vector<2x96xf32> to vector<2x32xf32>
    %72 = vector.extract_strided_slice %54 {offsets = [0, 64], sizes = [2, 32], strides = [1, 1]} : vector<2x96xf32> to vector<2x32xf32>
    %73 = arith.mulf %62, %72 : vector<2x32xf32>
    %74 = arith.addf %71, %73 : vector<2x32xf32>
    %75 = math.tanh %74 : vector<2x32xf32>
    %cst_26 = arith.constant 1.000000e+00 : f32
    %76 = vector.broadcast %cst_26 : f32 to vector<2x32xf32>
    %77 = arith.subf %76, %70 : vector<2x32xf32>
    %78 = arith.mulf %77, %75 : vector<2x32xf32>
    %79 = arith.mulf %70, %45 : vector<2x32xf32>
    %80 = arith.addf %78, %79 : vector<2x32xf32>
    %81 = arith.index_cast %49 : i32 to index
    %c0_27 = arith.constant 0 : index
    %82 = vector.load %arg7[%81, %c0_27] : memref<8x32xf32, #tpu.memory_space<vmem>>, vector<2x32xf32>
    tpu.vector_store %arg7[%81, %c0_27], %80 {strides = array<i32>} : memref<8x32xf32, #tpu.memory_space<vmem>>, vector<2x32xf32>,
    %c2_i32_28 = arith.constant 2 : i32
    %c2_i32_29 = arith.constant 2 : i32
    %83 = arith.muli %c2_i32_28, %c2_i32_29 : i32
    %84 = tpu.assume_multiple %83, 2 : i32
    %85 = arith.index_cast %84 : i32 to index
    %c0_30 = arith.constant 0 : index
    %86 = vector.load %arg11[%85, %c0_30] : memref<8x96xf32, #tpu.memory_space<vmem>>, vector<2x96xf32>
    %cst_31 = arith.constant dense<0.000000e+00> : vector<2x96xf32>
    %87 = tpu.matmul %80, %10, %cst_31 {dimension_numbers = #tpu.dot_dimension_numbers<[1], [0], [0], [1], [0, 0, 1, 1], [], []>} : vector<2x32xf32>, vector<32x96xf32>, vector<2x96xf32> -> vector<2x96xf32>
    %88 = vector.broadcast %11 : vector<1x96xf32> to vector<2x96xf32>
    %89 = arith.addf %87, %88 : vector<2x96xf32>
    %90 = vector.extract_strided_slice %86 {offsets = [0, 0], sizes = [2, 32], strides = [1, 1]} : vector<2x96xf32> to vector<2x32xf32>
    %91 = vector.extract_strided_slice %89 {offsets = [0, 0], sizes = [2, 32], strides = [1, 1]} : vector<2x96xf32> to vector<2x32xf32>
    %92 = arith.addf %90, %91 : vector<2x32xf32>
    %93 = arith.negf %92 : vector<2x32xf32>
    %94 = math.exp %93 : vector<2x32xf32>
    %cst_32 = arith.constant 1.000000e+00 : f32
    %95 = vector.broadcast %cst_32 : f32 to vector<2x32xf32>
    %96 = arith.addf %95, %94 : vector<2x32xf32>
    %97 = arith.divf %95, %96 : vector<2x32xf32>
    %98 = vector.extract_strided_slice %86 {offsets = [0, 32], sizes = [2, 32], strides = [1, 1]} : vector<2x96xf32> to vector<2x32xf32>
    %99 = vector.extract_strided_slice %89 {offsets = [0, 32], sizes = [2, 32], strides = [1, 1]} : vector<2x96xf32> to vector<2x32xf32>
    %100 = arith.addf %98, %99 : vector<2x32xf32>
    %101 = arith.negf %100 : vector<2x32xf32>
    %102 = math.exp %101 : vector<2x32xf32>
    %cst_33 = arith.constant 1.000000e+00 : f32
    %103 = vector.broadcast %cst_33 : f32 to vector<2x32xf32>
    %104 = arith.addf %103, %102 : vector<2x32xf32>
    %105 = arith.divf %103, %104 : vector<2x32xf32>
    %106 = vector.extract_strided_slice %86 {offsets = [0, 64], sizes = [2, 32], strides = [1, 1]} : vector<2x96xf32> to vector<2x32xf32>
    %107 = vector.extract_strided_slice %89 {offsets = [0, 64], sizes = [2, 32], strides = [1, 1]} : vector<2x96xf32> to vector<2x32xf32>
    %108 = arith.mulf %97, %107 : vector<2x32xf32>
    %109 = arith.addf %106, %108 : vector<2x32xf32>
    %110 = math.tanh %109 : vector<2x32xf32>
    %cst_34 = arith.constant 1.000000e+00 : f32
    %111 = vector.broadcast %cst_34 : f32 to vector<2x32xf32>
    %112 = arith.subf %111, %105 : vector<2x32xf32>
    %113 = arith.mulf %112, %110 : vector<2x32xf32>
    %114 = arith.mulf %105, %80 : vector<2x32xf32>
    %115 = arith.addf %113, %114 : vector<2x32xf32>
    %116 = arith.index_cast %84 : i32 to index
    %c0_35 = arith.constant 0 : index
    %117 = vector.load %arg7[%116, %c0_35] : memref<8x32xf32, #tpu.memory_space<vmem>>, vector<2x32xf32>
    tpu.vector_store %arg7[%116, %c0_35], %115 {strides = array<i32>} : memref<8x32xf32, #tpu.memory_space<vmem>>, vector<2x32xf32>,
    %c3_i32 = arith.constant 3 : i32
    %c2_i32_36 = arith.constant 2 : i32
    %118 = arith.muli %c3_i32, %c2_i32_36 : i32
    %119 = tpu.assume_multiple %118, 2 : i32
    %120 = arith.index_cast %119 : i32 to index
    %c0_37 = arith.constant 0 : index
    %121 = vector.load %arg11[%120, %c0_37] : memref<8x96xf32, #tpu.memory_space<vmem>>, vector<2x96xf32>
    %cst_38 = arith.constant dense<0.000000e+00> : vector<2x96xf32>
    %122 = tpu.matmul %115, %10, %cst_38 {dimension_numbers = #tpu.dot_dimension_numbers<[1], [0], [0], [1], [0, 0, 1, 1], [], []>} : vector<2x32xf32>, vector<32x96xf32>, vector<2x96xf32> -> vector<2x96xf32>
    %123 = vector.broadcast %11 : vector<1x96xf32> to vector<2x96xf32>
    %124 = arith.addf %122, %123 : vector<2x96xf32>
    %125 = vector.extract_strided_slice %121 {offsets = [0, 0], sizes = [2, 32], strides = [1, 1]} : vector<2x96xf32> to vector<2x32xf32>
    %126 = vector.extract_strided_slice %124 {offsets = [0, 0], sizes = [2, 32], strides = [1, 1]} : vector<2x96xf32> to vector<2x32xf32>
    %127 = arith.addf %125, %126 : vector<2x32xf32>
    %128 = arith.negf %127 : vector<2x32xf32>
    %129 = math.exp %128 : vector<2x32xf32>
    %cst_39 = arith.constant 1.000000e+00 : f32
    %130 = vector.broadcast %cst_39 : f32 to vector<2x32xf32>
    %131 = arith.addf %130, %129 : vector<2x32xf32>
    %132 = arith.divf %130, %131 : vector<2x32xf32>
    %133 = vector.extract_strided_slice %121 {offsets = [0, 32], sizes = [2, 32], strides = [1, 1]} : vector<2x96xf32> to vector<2x32xf32>
    %134 = vector.extract_strided_slice %124 {offsets = [0, 32], sizes = [2, 32], strides = [1, 1]} : vector<2x96xf32> to vector<2x32xf32>
    %135 = arith.addf %133, %134 : vector<2x32xf32>
    %136 = arith.negf %135 : vector<2x32xf32>
    %137 = math.exp %136 : vector<2x32xf32>
    %cst_40 = arith.constant 1.000000e+00 : f32
    %138 = vector.broadcast %cst_40 : f32 to vector<2x32xf32>
    %139 = arith.addf %138, %137 : vector<2x32xf32>
    %140 = arith.divf %138, %139 : vector<2x32xf32>
    %141 = vector.extract_strided_slice %121 {offsets = [0, 64], sizes = [2, 32], strides = [1, 1]} : vector<2x96xf32> to vector<2x32xf32>
    %142 = vector.extract_strided_slice %124 {offsets = [0, 64], sizes = [2, 32], strides = [1, 1]} : vector<2x96xf32> to vector<2x32xf32>
    %143 = arith.mulf %132, %142 : vector<2x32xf32>
    %144 = arith.addf %141, %143 : vector<2x32xf32>
    %145 = math.tanh %144 : vector<2x32xf32>
    %cst_41 = arith.constant 1.000000e+00 : f32
    %146 = vector.broadcast %cst_41 : f32 to vector<2x32xf32>
    %147 = arith.subf %146, %140 : vector<2x32xf32>
    %148 = arith.mulf %147, %145 : vector<2x32xf32>
    %149 = arith.mulf %140, %115 : vector<2x32xf32>
    %150 = arith.addf %148, %149 : vector<2x32xf32>
    %151 = arith.index_cast %119 : i32 to index
    %c0_42 = arith.constant 0 : index
    %152 = vector.load %arg7[%151, %c0_42] : memref<8x32xf32, #tpu.memory_space<vmem>>, vector<2x32xf32>
    tpu.vector_store %arg7[%151, %c0_42], %150 {strides = array<i32>} : memref<8x32xf32, #tpu.memory_space<vmem>>, vector<2x32xf32>,
    %c4_i32 = arith.constant 4 : i32
    %c0_43 = arith.constant 0 : index
    %c0_44 = arith.constant 0 : index
    %153 = vector.load %arg9[%c0_43, %c0_44] : memref<2x32xf32, #tpu.memory_space<vmem>>, vector<2x32xf32>
    tpu.vector_store %arg9[%c0_43, %c0_44], %150 {strides = array<i32>} : memref<2x32xf32, #tpu.memory_space<vmem>>, vector<2x32xf32>,
    %c0_45 = arith.constant 0 : index
    %c0_46 = arith.constant 0 : index
    %154 = vector.load %arg7[%c0_45, %c0_46] : memref<8x32xf32, #tpu.memory_space<vmem>>, vector<8x32xf32>
    %c0_47 = arith.constant 0 : index
    %c0_48 = arith.constant 0 : index
    %155 = vector.load %arg6[%c0_47, %c0_48] : memref<8x1xf32, #tpu.memory_space<vmem>>, vector<8x1xf32>
    %156 = vector.broadcast %155 : vector<8x1xf32> to vector<8x32xf32>
    %157 = arith.mulf %154, %156 : vector<8x32xf32>
    %158 = arith.mulf %157, %157 : vector<8x32xf32>
    %cst_49 = arith.constant dense<0.000000e+00> : vector<8xf32>
    %159 = vector.multi_reduction <add>, %158, %cst_49 [1] : vector<8x32xf32> to vector<8xf32>
    %160 = vector.shape_cast %159 : vector<8xf32> to vector<8x1xf32>
    %161 = math.sqrt %160 : vector<8x1xf32>
    %cst_50 = arith.constant 9.99999993E-9 : f32
    %162 = vector.broadcast %cst_50 : f32 to vector<8x1xf32>
    %163 = arith.addf %161, %162 : vector<8x1xf32>
    %164 = tpu.reciprocal %163 : vector<8x1xf32> -> vector<8x1xf32>
    %165 = vector.broadcast %164 : vector<8x1xf32> to vector<8x32xf32>
    %166 = arith.mulf %157, %165 : vector<8x32xf32>
    %c0_51 = arith.constant 0 : index
    %c0_52 = arith.constant 0 : index
    %167 = vector.load %arg7[%c0_51, %c0_52] : memref<8x32xf32, #tpu.memory_space<vmem>>, vector<8x32xf32>
    tpu.vector_store %arg7[%c0_51, %c0_52], %166 {strides = array<i32>} : memref<8x32xf32, #tpu.memory_space<vmem>>, vector<8x32xf32>,
    %168 = vector.extract_strided_slice %166 {offsets = [0, 0], sizes = [2, 32], strides = [1, 1]} : vector<8x32xf32> to vector<2x32xf32>
    %169 = vector.extract_strided_slice %166 {offsets = [2, 0], sizes = [2, 32], strides = [1, 1]} : vector<8x32xf32> to vector<2x32xf32>
    %170 = arith.addf %168, %169 : vector<2x32xf32>
    %171 = vector.extract_strided_slice %166 {offsets = [4, 0], sizes = [2, 32], strides = [1, 1]} : vector<8x32xf32> to vector<2x32xf32>
    %172 = arith.addf %170, %171 : vector<2x32xf32>
    %173 = vector.extract_strided_slice %166 {offsets = [6, 0], sizes = [2, 32], strides = [1, 1]} : vector<8x32xf32> to vector<2x32xf32>
    %174 = arith.addf %172, %173 : vector<2x32xf32>
    %c0_53 = arith.constant 0 : index
    %c0_54 = arith.constant 0 : index
    %175 = vector.load %arg10[%c0_53, %c0_54] : memref<2x32xf32, #tpu.memory_space<vmem>>, vector<2x32xf32>
    %176 = arith.addf %175, %174 : vector<2x32xf32>
    %c0_55 = arith.constant 0 : index
    %c0_56 = arith.constant 0 : index
    %177 = vector.load %arg10[%c0_55, %c0_56] : memref<2x32xf32, #tpu.memory_space<vmem>>, vector<2x32xf32>
    tpu.vector_store %arg10[%c0_55, %c0_56], %176 {strides = array<i32>} : memref<2x32xf32, #tpu.memory_space<vmem>>, vector<2x32xf32>,
    %c1_i32_57 = arith.constant 1 : i32
    %178 = arith.cmpi eq, %arg0, %c1_i32_57 : i32
    %179 = arith.extui %178 : i1 to i32
    %c0_i32_58 = arith.constant 0 : i32
    %180 = arith.cmpi ne, %179, %c0_i32_58 : i32
    scf.if %180 {
      %c0_59 = arith.constant 0 : index
      %c0_60 = arith.constant 0 : index
      %181 = vector.load %arg10[%c0_59, %c0_60] : memref<2x32xf32, #tpu.memory_space<vmem>>, vector<2x32xf32>
      %cst_61 = arith.constant 1.250000e-01 : f32
      %182 = vector.broadcast %cst_61 : f32 to vector<2x32xf32>
      %183 = arith.mulf %181, %182 : vector<2x32xf32>
      %184 = arith.mulf %183, %183 : vector<2x32xf32>
      %cst_62 = arith.constant dense<0.000000e+00> : vector<2xf32>
      %185 = vector.multi_reduction <add>, %184, %cst_62 [1] : vector<2x32xf32> to vector<2xf32>
      %186 = vector.shape_cast %185 : vector<2xf32> to vector<2x1xf32>
      %187 = math.sqrt %186 : vector<2x1xf32>
      %cst_63 = arith.constant 9.99999993E-9 : f32
      %188 = vector.broadcast %cst_63 : f32 to vector<2x1xf32>
      %189 = arith.addf %187, %188 : vector<2x1xf32>
      %190 = tpu.reciprocal %189 : vector<2x1xf32> -> vector<2x1xf32>
      %191 = vector.broadcast %190 : vector<2x1xf32> to vector<2x32xf32>
      %192 = arith.mulf %183, %191 : vector<2x32xf32>
      %c0_64 = arith.constant 0 : index
      %c0_65 = arith.constant 0 : index
      %193 = vector.load %arg8[%c0_64, %c0_65] : memref<2x32xf32, #tpu.memory_space<vmem>>, vector<2x32xf32>
      tpu.vector_store %arg8[%c0_64, %c0_65], %192 {strides = array<i32>} : memref<2x32xf32, #tpu.memory_space<vmem>>, vector<2x32xf32>,
    } else {
    }
    return
  }
  func.func @transform_0(%arg0: i32) -> (i32, i32) {
    %c0_i32 = arith.constant 0 : i32
    %c0_i32_0 = arith.constant 0 : i32
    return %arg0, %c0_i32 : i32, i32
  }
  func.func @transform_1(%arg0: i32) -> (i32, i32) {
    %c0_i32 = arith.constant 0 : i32
    %c0_i32_0 = arith.constant 0 : i32
    %c0_i32_1 = arith.constant 0 : i32
    return %c0_i32, %c0_i32_0 : i32, i32
  }
  func.func @transform_2(%arg0: i32) -> (i32, i32) {
    %c0_i32 = arith.constant 0 : i32
    %c0_i32_0 = arith.constant 0 : i32
    %c0_i32_1 = arith.constant 0 : i32
    return %c0_i32, %c0_i32_0 : i32, i32
  }
  func.func @transform_3(%arg0: i32) -> (i32, i32) {
    %c0_i32 = arith.constant 0 : i32
    %c0_i32_0 = arith.constant 0 : i32
    %c0_i32_1 = arith.constant 0 : i32
    return %c0_i32, %c0_i32_0 : i32, i32
  }
  func.func @transform_4(%arg0: i32) -> (i32, i32) {
    %c0_i32 = arith.constant 0 : i32
    %c0_i32_0 = arith.constant 0 : i32
    %c0_i32_1 = arith.constant 0 : i32
    return %c0_i32, %c0_i32_0 : i32, i32
  }
  func.func @transform_5(%arg0: i32) -> (i32, i32) {
    %c0_i32 = arith.constant 0 : i32
    %c0_i32_0 = arith.constant 0 : i32
    return %arg0, %c0_i32 : i32, i32
  }
  func.func @transform_6(%arg0: i32) -> (i32, i32) {
    %c0_i32 = arith.constant 0 : i32
    %c0_i32_0 = arith.constant 0 : i32
    return %arg0, %c0_i32 : i32, i32
  }
  func.func @transform_7(%arg0: i32) -> (i32, i32) {
    %c0_i32 = arith.constant 0 : i32
    %c0_i32_0 = arith.constant 0 : i32
    %c0_i32_1 = arith.constant 0 : i32
    return %c0_i32, %c0_i32_0 : i32, i32
  }
}

</mosaic_0001>

<bundles_post_ra>
// kernel: tpu_custom_call.1
= control target key start
LH: loop header
LB: loop body
LE: loop exit
PB: predicated region body
PF: predicated region fallthrough
CT: control target
= control target key end

     0   :  { %s1423_s0 = inlined_call_operand.vmem [shape: f32[16,32], index: 0, kind: input, shape index: {}]   ;;  %s1424_s1 = inlined_call_operand.hbm [shape: f32[32,96], index: 1, kind: input, shape index: {}]   ;;  %s1425_s2 = inlined_call_operand.hbm [shape: f32[32,96], index: 2, kind: input, shape index: {}]   ;;  %s1426_s3 = inlined_call_operand.vmem [shape: f32[1,96], index: 3, kind: input, shape index: {}]   ;;  %s1427_s4 = inlined_call_operand.vmem [shape: f32[1,96], index: 4, kind: input, shape index: {}]   ;;  %s1428_s5 = inlined_call_operand.vmem [shape: f32[16,1], index: 5, kind: input, shape index: {}]   ;;  %s1429_s6 = inlined_call_operand.hbm [shape: f32[16,32], index: 6, kind: output, shape index: {0}]   ;;  %s1430_s7 = inlined_call_operand.hbm [shape: f32[2,32], index: 7, kind: output, shape index: {1}]  }
   0x1   :  { %1431 = sst [smem:[#allocation17_spill]] %s1423_s0 }
   0x2   :  { %13 = vsyncpa [#allocation6], 0 }
   0x3   :  { %14 = vsyncpa [#allocation9], 0 }
   0x4   :  { %15 = vsyncpa [#allocation7], 0 }
   0x5   :  { %17 = vsyncpa [#allocation7 + $0x1], 0 }
   0x6   :  { %18 = vsyncpa [#allocation12], 0  ;;  %s1236_s24 = smov 0   ;;  %s1238_s25 = smov 0  }
   0x7   :  { %s1240_s26 = smov 0   ;;  %s1242_s27 = smov 0  }
   0x8 LB: > { %s1257_s28 = sadd.s32 4294967295, %s1184_s27   ;;  %s881_s29 = sadd.s32 4294967294, %s1184_s27   ;;  %s1184_s27 = sphi %s1242_s27, %s1439_s27   ;;  %s1180_s26 = sphi %s1240_s26, %s1438_s26   ;;  %s1176_s25 = sphi %s1238_s25, %s1437_s25   ;;  %s1172_s24 = sphi %s1236_s24, %s1436_s24  }
   0x9   : > { %s1261_s30 = sadd.s32 1, %s1184_s27   ;;  %s167_s8 = sadd.s32 1, %s1180_s26 }
   0xa   : > { %s164_s9 = ssub.s32 %s1184_s27, %s1261_s30  ;;  %p177_p0 = scmp.ne.s32.totalorder %s1180_s26, %s1176_s25 }
   0xb   : > { %p165_p1 = scmp.eq.s32.totalorder %s164_s9, 0  ;;  %p178_p2 = scmp.eq.s32.totalorder %s1257_s28, 1 }
   0xc   : > { %p183_p3 = scmp.ne.s32.totalorder %s1176_s25, %s1172_s24  ;;  %p184_p4 = scmp.eq.s32.totalorder %s881_s29, 1 }
   0xd   : > { %s1272_s10 = scalar_select %p165_p1, %s1180_s26, %s167_s8  }
   0xe   : > { %p1276_p5 = por %p178_p2, %p177_p0  ;;  %p1280_p6 = por %p184_p4, %p183_p3 }
   0xf   : > { %p882_p7 = scmp.ge.s32.totalorder %s1184_s27, 1  ;;  %p212_p8 = scmp.lt.s32.totalorder %s1184_s27, 3 }
  0x10   : > { %p883_p9 = scmp.ne.s32.totalorder %s1257_s28, 0  ;;  %p937_p10 = scmp.eq.s32.totalorder %s1257_s28, 0 }
  0x11   : > { %p1288_p11 = pnand %p882_p7, %p212_p8  ;;  %s223_s16 = sshll.u32 %s1424_s1, 4  ;;  %s224_s16 = int_to_ptr.hbm [resolvable:$true] %s223_s16 }
  0x12   : > { %s1186_s17 = smov [#allocation5]   ;;  %s237_s21 = sshll.u32 %s1425_s2, 4  ;;  %s238_s21 = int_to_ptr.hbm [resolvable:$true] %s237_s21 }
  0x13   : > { %p926_p12 = pneg %p1288_p11  ;;  %s225_s18 = sshll.u32 %s1186_s17, 4  ;;  %s226_s18 = int_to_ptr.vmem [resolvable:$true] %s225_s18 }
  0x14   : > { %s1187_s22 = smov 128   ;;  %s1188_s23 = smov 8  }
  0x15   : > { %p927_p13 = pnand %p937_p10, %p926_p12  ;;  %s1189_s29 = smov [#allocation8]  }
  0x16   : > { %s239_s8 = sshll.u32 %s1189_s29, 4  ;;  %275 = sbr.rel (%p1288_p11) target bundleno = 2735 (0xaaf), region = 44  ;;  %s240_s8 = int_to_ptr.vmem [resolvable:$true] %s239_s8 }
  0x17   : > { %929 = dma.hbm_to_vmem [thread:$0]  (!%p927_p13), %s224_s16, 512, %s226_s18, [#allocation6], %s1187_s22, %s1187_s22, %s1188_s23  }
  0x18   : > { %932 = dma.hbm_to_vmem [thread:$0]  (!%p927_p13), %s238_s21, 512, %s240_s8, [#allocation9], %s1187_s22, %s1187_s22, %s1188_s23  }
  0x1b   : > { %1155 = dma.done.wait (%p937_p10), [#allocation6], 512  }
  0x1c   : > { %1157 = vsyncadd (%p937_p10), [#allocation6], 4294966784 }
  0x1d   : > { %1159 = dma.done.wait (%p937_p10), [#allocation9], 512  }
  0x1e   : > { %1161 = vsyncadd (%p937_p10), [#allocation9], 4294966784  ;;  %s311_s9 = sand.u32 1, %s1176_s25   ;;  %p316_p0 = scmp.lt.s32.totalorder %s1257_s28, 1 }
  0x1f   : > { %s889_s13 = sshll.u32 %s311_s9, 3  ;;  %s1435_s0 = sld [smem:[#allocation17_spill]] }
  0x20   : > { %s317_s14 = scalar_select %p316_p0, %s1257_s28, 1 }
  0x21   : > { %s1325_s22 = scalar_lea.vmem [#allocation10], %s889_s13  ;;  %327 = sbr.rel (%p883_p9) target bundleno = 41 (0x29), region = 56 }
  0x22   : > { %s890_s15 = sshll.u32 %s317_s14, 3 }
  0x23   : > { %s1323_s21 = scalar_lea.vmem %s1428_s5, %s890_s15 }
  0x25   : > { %s319_s18 = scalar_lea.vmem %s1435_s0, %s890_s15 }
  0x26   : > { %vm328_vm0 = vcmask 254976   ;;  %v1190_v0 = vmov 0.0  }
  0x27   : > { %329 = vst.msk [vmem:[#allocation2] sm:$0x3] %vm328_vm0, %v1190_v0 }
  0x28   : > { %330 = vst.msk [vmem:[#allocation3] sm:$0x3] %vm328_vm0, %v1190_v0 }
  0x29 PF: > { %v335_v1 = vld [vmem:[#allocation5 + $0x18] sm:$0xff]  ;;  %v334_v3 = vld [vmem:[#allocation5 + $0x10] sm:$0xff]  ;;  %v333_v5 = vld [vmem:[#allocation5 + $0x8] sm:$0xff]  ;;  %vm340_vm1 = vcmask 261120   ;;  %vm364_vm2 = vcmask 785408   ;;  %s1191_s14 = smov 64  }
  0x2a   : > { %v369_v2 = vld [vmem:[#allocation8 + $0x18] sm:$0xff]  ;;  %356 = vmatpush.msra.mxu0 %v335_v1  ;;  %v368_v4 = vld [vmem:[#allocation8 + $0x10] sm:$0xff]  ;;  %v367_v6 = vld [vmem:[#allocation8 + $0x8] sm:$0xff]  ;;  %s1192_s15 = smov 96   ;;  %s1193_s16 = smov 32   ;;  %vm445_vm7 = vcmask 254976  }
  0x2b   : > { %391 = vmatpush.msra.mxu1 %v369_v2  ;;  %463 = vmatpush.msra.mxu2 %v369_v2  ;;  %v332_v7 = vld [vmem:[#allocation5] sm:$0xff]  ;;  %v331_v9 = vld [vmem:[%s319_s18] sm:$0xff]  ;;  %p905_p1 = scmp.ne.s32.totalorder %s1257_s28, 1 }
  0x2c   : > { %532 = vmatpush.msra.mxu3 %v369_v2  ;;  %357 = vmatpush.msra.mxu0 %v334_v3  ;;  %v366_v8 = vld [vmem:[#allocation8] sm:$0xff]  ;;  %v988_v11 = vld [vmem:[%s1426_s3] ss:$0 sm:$0xff] }
  0x2d   : > { %392 = vmatpush.msra.mxu1 %v368_v4  ;;  %464 = vmatpush.msra.mxu2 %v368_v4  ;;  %v1337_v12 = vld [vmem:[%s1427_s4] ss:$0 sm:$0xff] }
  0x2e   : > { %533 = vmatpush.msra.mxu3 %v368_v4  ;;  %358 = vmatpush.msra.mxu0 %v333_v5  ;;  %v371_v10 = vld [vmem:[#allocation2] sm:$0x3] }
  0x2f   : > { %393 = vmatpush.msra.mxu1 %v367_v6  ;;  %465 = vmatpush.msra.mxu2 %v367_v6 }
  0x30   : > { %534 = vmatpush.msra.mxu3 %v367_v6  ;;  %359 = vmatpush.msra.mxu0 %v332_v7 }
  0x31   : > { %394 = vmatpush.msra.mxu1 %v366_v8  ;;  %893 = vmatmul.msk.f32.vlgmr.msra.gmra.mxu0 %vm340_vm1, %v331_v9 }
  0x32   : > { %894 = vmatmul.msk.f32.vlgmr.msra.gmra.mxu1 %vm340_vm1, %v371_v10  ;;  %466 = vmatpush.msra.mxu2 %v366_v8 }
  0x33   : > { %535 = vmatpush.msra.mxu3 %v366_v8  ;;  %601 = vmatpush.msrb.mxu0 %v369_v2 }
  0x35   : > { %602 = vmatpush.msrb.mxu0 %v368_v4 }
  0x37   : > { %603 = vmatpush.msrb.mxu0 %v367_v6 }
  0x39   : > { %604 = vmatpush.msrb.mxu0 %v366_v8 }
  0xae   : > { %v361_v13 = vpop.f32.mrf.mxu0 }
  0xaf   : > { %v396_v14 = vpop.f32.mrf.mxu1  ;;  %v362_v15 = vadd.f32 %v988_v11, %v361_v13 }
  0xb0   : > { %v397_v16 = vadd.f32 %v1337_v12, %v396_v14 }
  0xb1   : > { %365 = vst.msk [vmem:[#allocation4] sm:$0xff] %vm364_vm2, %v362_v15 }
  0xb2   : > { %420 = vrot.lane.b32.xlu0 %v397_v16, %s1191_s14 }
  0xb8   : > { %v372_v17 = vld [vmem:[#allocation4] sm:$0x3]  ;;  %v448_v46 = vld [vmem:[#allocation4 + $0x2] sm:$0x3] }
  0xb9   : > { %v399_v18 = vadd.f32 %v397_v16, %v372_v17 }
  0xbb   : > { %v895_v19 = vmul.f32 -1.442695, %v399_v18 }
  0xbd   : > { %990 = vpow2.f32 %v895_v19 }
  0xc3   : > { %v991_v20 = vpop.eup %990 }
  0xc4   : > { %v403_v21 = vadd.f32 1.0, %v991_v20 }
  0xc6   : > { %992 = vrcp.f32 %v403_v21  ;;  %v415_v27 = vand.u32 2147483648, %v403_v21  ;;  %vm409_vm4 = vweird.f32 %v403_v21  ;;  %v413_v28 = vand.u32 2147483647, %v403_v21 }
  0xc8   : > { %v416_v30 = vor.u32 1.1754944e-38, %v415_v27  ;;  %vm414_vm6 = vcmp.eq.f32.partialorder %v413_v28, 8.507059e+37 }
  0xcc   : > { %v993_v22 = vpop.eup %992 }
  0xcd   : > { %v405_v23 = vmul.f32 %v993_v22, %v403_v21  ;;  %vm410_vm3 = vweird.f32 %v993_v22 }
  0xce   : > { %vm411_vm5 = vmor %vm409_vm4, %vm410_vm3 }
  0xcf   : > { %v406_v24 = vsub.f32 1.0, %v405_v23 }
  0xd1   : > { %v407_v25 = vmul.f32 %v993_v22, %v406_v24 }
  0xd3   : > { %v408_v26 = vadd.f32 %v993_v22, %v407_v25 }
  0xd5   : > { %v412_v29 = vsel %vm411_vm5, %v993_v22, %v408_v26 }
  0xd6   : > { %v417_v32 = vsel %vm414_vm6, %v416_v30, %v412_v29 }
  0xd7   : > { %v430_v38 = vsub.f32 1.0, %v417_v32 }
 0x124   : > { %v421_v31 = vpop.permute.xlu0 %420 }
 0x125   : > { %v423_v33 = vmul.f32 %v421_v31, %v417_v32 }
 0x127   : > { %425 = vrot.lane.b32.xlu0 %v423_v33, %s1191_s14 }
 0x199   : > { %v426_v34 = vpop.permute.xlu0 %425 }
 0x19a   : > { %v428_v35 = vadd.f32 %v426_v34, %v372_v17 }
 0x19c   : > { %994 = vtanh.f32 %v428_v35 }
 0x1a2   : > { %v995_v36 = vpop.eup %994 }
 0x1a3   : > { %432 = vrot.lane.b32.xlu1 %v995_v36, %s1192_s15 }
 0x1ab   : > { %436 = vrot.lane.b32.xlu1 %v371_v10, %s1193_s16  ;;  %v517_v10 = vld [vmem:[#allocation4 + $0x4] sm:$0x3] }
 0x215   : > { %v433_v37 = vpop.permute.xlu1 %432 }
 0x216   : > { %v435_v40 = vmul.f32 %v433_v37, %v430_v38 }
 0x21d   : > { %v437_v39 = vpop.permute.xlu1 %436 }
 0x21e   : > { %v439_v41 = vmul.f32 %v437_v39, %v417_v32  ;;  %v586_v39 = vld [vmem:[#allocation4 + $0x6] sm:$0x3] }
 0x220   : > { %v440_v42 = vadd.f32 %v439_v41, %v435_v40 }
 0x222   : > { %442 = vrot.lane.b32.xlu2 %v440_v42, %s1192_s15 }
 0x27c   : > { %v443_v43 = vpop.permute.xlu2 %442 }
 0x27d   : > { %446 = vst.msk [vmem:[%s1325_s22] sm:$0x3] %vm445_vm7, %v443_v43  ;;  %896 = vmatmul.msk.f32.vlgmr.msra.gmra.mxu2 %vm340_vm1, %v443_v43 }
 0x300   : > { %v468_v44 = vpop.f32.mrf.mxu2 }
 0x301   : > { %v469_v45 = vadd.f32 %v1337_v12, %v468_v44 }
 0x303   : > { %492 = vrot.lane.b32.xlu2 %v469_v45, %s1191_s14  ;;  %v471_v47 = vadd.f32 %v469_v45, %v448_v46 }
 0x305   : > { %v897_v48 = vmul.f32 -1.442695, %v471_v47 }
 0x307   : > { %996 = vpow2.f32 %v897_v48 }
 0x30d   : > { %v997_v49 = vpop.eup %996 }
 0x30e   : > { %v475_v50 = vadd.f32 1.0, %v997_v49 }
 0x310   : > { %998 = vrcp.f32 %v475_v50  ;;  %v487_v56 = vand.u32 2147483648, %v475_v50  ;;  %vm481_vm9 = vweird.f32 %v475_v50  ;;  %v485_v57 = vand.u32 2147483647, %v475_v50 }
 0x312   : > { %v488_v59 = vor.u32 1.1754944e-38, %v487_v56  ;;  %vm486_vm11 = vcmp.eq.f32.partialorder %v485_v57, 8.507059e+37 }
 0x316   : > { %v999_v51 = vpop.eup %998 }
 0x317   : > { %v477_v52 = vmul.f32 %v999_v51, %v475_v50  ;;  %vm482_vm8 = vweird.f32 %v999_v51 }
 0x318   : > { %vm483_vm10 = vmor %vm481_vm9, %vm482_vm8 }
 0x319   : > { %v478_v53 = vsub.f32 1.0, %v477_v52 }
 0x31b   : > { %v479_v54 = vmul.f32 %v999_v51, %v478_v53 }
 0x31d   : > { %v480_v55 = vadd.f32 %v999_v51, %v479_v54 }
 0x31f   : > { %v484_v58 = vsel %vm483_vm10, %v999_v51, %v480_v55 }
 0x320   : > { %v489_v61 = vsel %vm486_vm11, %v488_v59, %v484_v58  ;;  %v656_v58 = vld [vmem:[%s1323_s21] sm:$0xff]  ;;  %v1194_v59 = vmov 0  }
 0x321   : > { %v502_v2 = vsub.f32 1.0, %v489_v61  ;;  %v508_v4 = vmul.f32 %v489_v61, %v440_v42  ;;  %986 = vset.pattern.permute.xlu2 %v1194_v59  ;;  %987 = vset.pattern.permute.xlu0 %v1194_v59 }
 0x35d   : > { %v493_v60 = vpop.permute.xlu2 %492 }
 0x35e   : > { %v495_v62 = vmul.f32 %v493_v60, %v489_v61 }
 0x360   : > { %497 = vrot.lane.b32.xlu0 %v495_v62, %s1191_s14 }
 0x3d2   : > { %v498_v63 = vpop.permute.xlu0 %497 }
 0x3d3   : > { %v500_v0 = vadd.f32 %v498_v63, %v448_v46 }
 0x3d5   : > { %1000 = vtanh.f32 %v500_v0 }
 0x3db   : > { %v1001_v1 = vpop.eup %1000 }
 0x3dc   : > { %504 = vrot.lane.b32.xlu1 %v1001_v1, %s1192_s15 }
 0x44e   : > { %v505_v3 = vpop.permute.xlu1 %504 }
 0x44f   : > { %v507_v5 = vmul.f32 %v505_v3, %v502_v2 }
 0x451   : > { %v509_v6 = vadd.f32 %v508_v4, %v507_v5 }
 0x453   : > { %511 = vrot.lane.b32.xlu2 %v509_v6, %s1192_s15 }
 0x4ad   : > { %v512_v7 = vpop.permute.xlu2 %511 }
 0x4ae   : > { %898 = vst.msk [vmem:[%s1325_s22 + $0x2] sm:$0x3] %vm445_vm7, %v512_v7  ;;  %899 = vmatmul.msk.f32.vlgmr.msra.gmra.mxu3 %vm340_vm1, %v512_v7 }
 0x531   : > { %v537_v8 = vpop.f32.mrf.mxu3 }
 0x532   : > { %v538_v9 = vadd.f32 %v1337_v12, %v537_v8 }
 0x534   : > { %561 = vrot.lane.b32.xlu0 %v538_v9, %s1191_s14  ;;  %v540_v11 = vadd.f32 %v538_v9, %v517_v10 }
 0x536   : > { %v900_v13 = vmul.f32 -1.442695, %v540_v11 }
 0x538   : > { %1002 = vpow2.f32 %v900_v13 }
 0x53e   : > { %v1003_v14 = vpop.eup %1002 }
 0x53f   : > { %v544_v15 = vadd.f32 1.0, %v1003_v14 }
 0x541   : > { %1004 = vrcp.f32 %v544_v15  ;;  %v556_v21 = vand.u32 2147483648, %v544_v15  ;;  %vm550_vm13 = vweird.f32 %v544_v15  ;;  %v554_v22 = vand.u32 2147483647, %v544_v15 }
 0x543   : > { %v557_v24 = vor.u32 1.1754944e-38, %v556_v21  ;;  %vm555_vm15 = vcmp.eq.f32.partialorder %v554_v22, 8.507059e+37 }
 0x547   : > { %v1005_v16 = vpop.eup %1004 }
 0x548   : > { %v546_v17 = vmul.f32 %v1005_v16, %v544_v15  ;;  %vm551_vm12 = vweird.f32 %v1005_v16 }
 0x549   : > { %vm552_vm14 = vmor %vm550_vm13, %vm551_vm12 }
 0x54a   : > { %v547_v18 = vsub.f32 1.0, %v546_v17 }
 0x54c   : > { %v548_v19 = vmul.f32 %v1005_v16, %v547_v18 }
 0x54e   : > { %v549_v20 = vadd.f32 %v1005_v16, %v548_v19 }
 0x550   : > { %v553_v23 = vsel %vm552_vm14, %v1005_v16, %v549_v20 }
 0x551   : > { %v558_v26 = vsel %vm555_vm15, %v557_v24, %v553_v23 }
 0x552   : > { %v571_v31 = vsub.f32 1.0, %v558_v26  ;;  %v577_v33 = vmul.f32 %v558_v26, %v509_v6 }
 0x5a6   : > { %v562_v25 = vpop.permute.xlu0 %561 }
 0x5a7   : > { %v564_v27 = vmul.f32 %v562_v25, %v558_v26 }
 0x5a9   : > { %566 = vrot.lane.b32.xlu1 %v564_v27, %s1191_s14 }
 0x61b   : > { %v567_v28 = vpop.permute.xlu1 %566 }
 0x61c   : > { %v569_v29 = vadd.f32 %v567_v28, %v517_v10 }
 0x61e   : > { %1006 = vtanh.f32 %v569_v29 }
 0x624   : > { %v1007_v30 = vpop.eup %1006 }
 0x625   : > { %573 = vrot.lane.b32.xlu2 %v1007_v30, %s1192_s15 }
 0x67f   : > { %v574_v32 = vpop.permute.xlu2 %573 }
 0x680   : > { %v576_v34 = vmul.f32 %v574_v32, %v571_v31 }
 0x682   : > { %v578_v35 = vadd.f32 %v577_v33, %v576_v34 }
 0x684   : > { %580 = vrot.lane.b32.xlu0 %v578_v35, %s1192_s15 }
 0x6f6   : > { %v581_v36 = vpop.permute.xlu0 %580 }
 0x6f7   : > { %901 = vst.msk [vmem:[%s1325_s22 + $0x4] sm:$0x3] %vm445_vm7, %v581_v36  ;;  %902 = vmatmul.msk.f32.vlgmr.msrb.gmra.mxu0 %vm340_vm1, %v581_v36  ;;  %v706_v36 = vld [vmem:[#allocation3] sm:$0x3] }
 0x774   : > { %v606_v37 = vpop.f32.mrf.mxu0 }
 0x775   : > { %v607_v38 = vadd.f32 %v1337_v12, %v606_v37 }
 0x777   : > { %630 = vrot.lane.b32.xlu1 %v607_v38, %s1191_s14  ;;  %v609_v40 = vadd.f32 %v607_v38, %v586_v39 }
 0x779   : > { %v903_v41 = vmul.f32 -1.442695, %v609_v40 }
 0x77b   : > { %1008 = vpow2.f32 %v903_v41 }
 0x781   : > { %v1009_v42 = vpop.eup %1008 }
 0x782   : > { %v613_v43 = vadd.f32 1.0, %v1009_v42 }
 0x784   : > { %1010 = vrcp.f32 %v613_v43  ;;  %v625_v49 = vand.u32 2147483648, %v613_v43  ;;  %vm619_vm2 = vweird.f32 %v613_v43  ;;  %v623_v50 = vand.u32 2147483647, %v613_v43 }
 0x786   : > { %v626_v51 = vor.u32 1.1754944e-38, %v625_v49  ;;  %vm624_vm4 = vcmp.eq.f32.partialorder %v623_v50, 8.507059e+37 }
 0x78a   : > { %v1011_v44 = vpop.eup %1010 }
 0x78b   : > { %v615_v45 = vmul.f32 %v1011_v44, %v613_v43  ;;  %vm620_vm0 = vweird.f32 %v1011_v44 }
 0x78c   : > { %vm621_vm3 = vmor %vm619_vm2, %vm620_vm0 }
 0x78d   : > { %v616_v46 = vsub.f32 1.0, %v615_v45 }
 0x78f   : > { %v617_v47 = vmul.f32 %v1011_v44, %v616_v46 }
 0x791   : > { %v618_v48 = vadd.f32 %v1011_v44, %v617_v47 }
 0x793   : > { %v622_v12 = vsel %vm621_vm3, %v1011_v44, %v618_v48 }
 0x794   : > { %v627_v53 = vsel %vm624_vm4, %v626_v51, %v622_v12 }
 0x795   : > { %v640_v60 = vsub.f32 1.0, %v627_v53  ;;  %v646_v62 = vmul.f32 %v627_v53, %v578_v35 }
 0x7e9   : > { %v631_v52 = vpop.permute.xlu1 %630 }
 0x7ea   : > { %v633_v54 = vmul.f32 %v631_v52, %v627_v53 }
 0x7ec   : > { %635 = vrot.lane.b32.xlu2 %v633_v54, %s1191_s14 }
 0x7f4   : > { %659 = vperm.xlu2 %986, %v656_v58  }
 0x846   : > { %v636_v55 = vpop.permute.xlu2 %635 }
 0x847   : > { %v638_v56 = vadd.f32 %v636_v55, %v586_v39 }
 0x849   : > { %1012 = vtanh.f32 %v638_v56 }
 0x84e   : > { %v660_v2 = vpop.permute.xlu2 %659 }
 0x84f   : > { %v1013_v57 = vpop.eup %1012 }
 0x850   : > { %642 = vrot.lane.b32.xlu0 %v1013_v57, %s1192_s15 }
 0x8c2   : > { %v643_v61 = vpop.permute.xlu0 %642 }
 0x8c3   : > { %v645_v63 = vmul.f32 %v643_v61, %v640_v60 }
 0x8c5   : > { %v647_v0 = vadd.f32 %v646_v62, %v645_v63 }
 0x8c7   : > { %649 = vrot.lane.b32.xlu1 %v647_v0, %s1192_s15 }
 0x939   : > { %v650_v1 = vpop.permute.xlu1 %649 }
 0x93a   : > { %904 = vst.msk [vmem:[%s1325_s22 + $0x6] sm:$0x3] %vm445_vm7, %v650_v1 }
 0x93b   : > { %654 = vst.msk [vmem:[#allocation2] sm:$0x3] %vm445_vm7, %v650_v1 }
 0x941   : > { %v655_v3 = vld [vmem:[%s1325_s22] sm:$0xff] }
 0x942   : > { %v662_v4 = vmul.f32 %v660_v2, %v655_v3 }
 0x944   : > { %v663_v5 = vmul.f32 %v662_v4, %v662_v4 }
 0x946   : > { %v664_v6 = vsel %vm340_vm1, %v663_v5, 0.0 }
 0x947   : > { %665 = vadd.xlane.f32.xlu0 %v664_v6 }
 0x9ba   : > { %v666_v7 = vpop.xlane.xlu0 %665 }
 0x9bb   : > { %1014 = vrsqrt.f32 %v666_v7  ;;  %vm674_vm5 = vcmp.eq.f32.partialorder %v666_v7, inf  ;;  %v677_v16 = vand.u32 2147483648, %v666_v7  ;;  %vm676_vm6 = vcmp.eq.f32.partialorder %v666_v7, 0.0 }
 0x9c1   : > { %v1015_v8 = vpop.eup %1014 }
 0x9c2   : > { %v668_v9 = vmul.f32 %v1015_v8, %v666_v7 }
 0x9c4   : > { %v669_v10 = vmul.f32 %v1015_v8, %v668_v9 }
 0x9c6   : > { %v670_v11 = vmul.f32 0.5, %v669_v10 }
 0x9c8   : > { %v671_v13 = vsub.f32 1.5, %v670_v11 }
 0x9ca   : > { %v672_v14 = vmul.f32 %v1015_v8, %v671_v13 }
 0x9cc   : > { %v673_v15 = vmul.f32 %v672_v14, %v666_v7 }
 0x9ce   : > { %v675_v17 = vsel %vm674_vm5, %v666_v7, %v673_v15 }
 0x9cf   : > { %v678_v18 = vsel %vm676_vm6, %v677_v16, %v675_v17 }
 0x9d0   : > { %v679_v19 = vadd.f32 1e-08, %v678_v18 }
 0x9d2   : > { %1016 = vrcp.f32 %v679_v19  ;;  %v691_v23 = vand.u32 2147483648, %v679_v19  ;;  %v689_v25 = vand.u32 2147483647, %v679_v19  ;;  %vm685_vm9 = vweird.f32 %v679_v19 }
 0x9d4   : > { %v692_v27 = vor.u32 1.1754944e-38, %v691_v23  ;;  %vm690_vm11 = vcmp.eq.f32.partialorder %v689_v25, 8.507059e+37 }
 0x9d8   : > { %v1017_v20 = vpop.eup %1016 }
 0x9d9   : > { %v681_v21 = vmul.f32 %v1017_v20, %v679_v19  ;;  %vm686_vm8 = vweird.f32 %v1017_v20 }
 0x9da   : > { %vm687_vm10 = vmor %vm685_vm9, %vm686_vm8 }
 0x9db   : > { %v682_v22 = vsub.f32 1.0, %v681_v21 }
 0x9dd   : > { %v683_v24 = vmul.f32 %v1017_v20, %v682_v22 }
 0x9df   : > { %v684_v26 = vadd.f32 %v1017_v20, %v683_v24 }
 0x9e1   : > { %v688_v28 = vsel %vm687_vm10, %v1017_v20, %v684_v26 }
 0x9e2   : > { %v693_v29 = vsel %vm690_vm11, %v692_v27, %v688_v28 }
 0x9e3   : > { %v694_v30 = vmul.f32 %v693_v29, %v662_v4 }
 0x9e5   : > { %695 = vst.msk [vmem:[%s1325_s22] sm:$0xff] %vm340_vm1, %v694_v30  ;;  %v697_v31 = vrot.slane %v694_v30, 2  ;;  %v700_v33 = vrot.slane %v694_v30, 4  ;;  %v703_v35 = vrot.slane %v694_v30, 6 }
 0x9e7   : > { %v699_v32 = vadd.f32 %v697_v31, %v694_v30 }
 0x9e9   : > { %v702_v34 = vadd.f32 %v700_v33, %v699_v32 }
 0x9eb   : > { %v705_v37 = vadd.f32 %v703_v35, %v702_v34  ;;  %712 = sbr.rel (%p905_p1) target bundleno = 2715 (0xa9b), region = 60 }
 0x9ed   : > { %v707_v38 = vadd.f32 %v706_v36, %v705_v37 }
 0x9ef   : > { %708 = vst.msk [vmem:[#allocation3] sm:$0x3] %vm445_vm7, %v707_v38 }
 0x9f6   : > { %v713_v39 = vld [vmem:[#allocation3] sm:$0x3] }
 0x9f7   : > { %v714_v40 = vmul.f32 0.125, %v713_v39 }
 0x9f9   : > { %v715_v41 = vmul.f32 %v714_v40, %v714_v40 }
 0x9fb   : > { %v716_v42 = vsel %vm445_vm7, %v715_v41, 0.0 }
 0x9fc   : > { %717 = vadd.xlane.f32.xlu0 %v716_v42 }
 0xa6f   : > { %v718_v43 = vpop.xlane.xlu0 %717 }
 0xa70   : > { %1018 = vrsqrt.f32 %v718_v43  ;;  %vm726_vm1 = vcmp.eq.f32.partialorder %v718_v43, inf  ;;  %v729_v12 = vand.u32 2147483648, %v718_v43  ;;  %vm728_vm12 = vcmp.eq.f32.partialorder %v718_v43, 0.0 }
 0xa76   : > { %v1019_v44 = vpop.eup %1018 }
 0xa77   : > { %v720_v45 = vmul.f32 %v1019_v44, %v718_v43 }
 0xa79   : > { %v721_v46 = vmul.f32 %v1019_v44, %v720_v45 }
 0xa7b   : > { %v722_v47 = vmul.f32 0.5, %v721_v46 }
 0xa7d   : > { %v723_v48 = vsub.f32 1.5, %v722_v47 }
 0xa7f   : > { %v724_v49 = vmul.f32 %v1019_v44, %v723_v48 }
 0xa81   : > { %v725_v50 = vmul.f32 %v724_v49, %v718_v43 }
 0xa83   : > { %v727_v51 = vsel %vm726_vm1, %v718_v43, %v725_v50 }
 0xa84   : > { %v730_v52 = vsel %vm728_vm12, %v729_v12, %v727_v51 }
 0xa85   : > { %v731_v53 = vadd.f32 1e-08, %v730_v52 }
 0xa87   : > { %1020 = vrcp.f32 %v731_v53  ;;  %v743_v57 = vand.u32 2147483648, %v731_v53  ;;  %v741_v59 = vand.u32 2147483647, %v731_v53  ;;  %vm737_vm14 = vweird.f32 %v731_v53 }
 0xa89   : > { %v744_v61 = vor.u32 1.1754944e-38, %v743_v57  ;;  %vm742_vm0 = vcmp.eq.f32.partialorder %v741_v59, 8.507059e+37 }
 0xa8d   : > { %v1021_v54 = vpop.eup %1020 }
 0xa8e   : > { %v733_v55 = vmul.f32 %v1021_v54, %v731_v53  ;;  %vm738_vm13 = vweird.f32 %v1021_v54 }
 0xa8f   : > { %vm739_vm15 = vmor %vm737_vm14, %vm738_vm13 }
 0xa90   : > { %v734_v56 = vsub.f32 1.0, %v733_v55 }
 0xa92   : > { %v735_v58 = vmul.f32 %v1021_v54, %v734_v56 }
 0xa94   : > { %v736_v60 = vadd.f32 %v1021_v54, %v735_v58 }
 0xa96   : > { %v740_v62 = vsel %vm739_vm15, %v1021_v54, %v736_v60 }
 0xa97   : > { %v745_v63 = vsel %vm742_vm0, %v744_v61, %v740_v62 }
 0xa98   : > { %v746_v0 = vmul.f32 %v745_v63, %v714_v40 }
 0xa9a   : > { %747 = vst.msk [vmem:[#allocation11] sm:$0x3] %vm445_vm7, %v746_v0 }
 0xa9b PF: > { %s907_s17 = sshll.u32 %s1257_s28, 3  ;;  %s761_s21 = sshll.u32 %s1325_s22, 4  ;;  %s762_s21 = int_to_ptr.vmem [resolvable:$true] %s761_s21 }
 0xa9c   : > { %s759_s20 = scalar_lea.hbm %s1429_s6, %s907_s17  ;;  %s749_s29 = scalar_lea.sflag [#allocation7], %s311_s9 }
 0xa9d   : > { %s763_s23 = sshll.u32 %s759_s20, 4  ;;  %s1102_s16 = scalar_lea.hbm %s1429_s6, 16  ;;  %s764_s23 = int_to_ptr.hbm [resolvable:$true] %s763_s23 }
 0xa9e   : > { %s1096_s8 = sshra.s32 %s764_s23, 4  ;;  %s1097_s8 = int_to_ptr.hbm [resolvable:$true] %s1096_s8 }
 0xa9f   : > { %s1098_s13 = scalar_lea.hbm %s1097_s8, 8  ;;  %p1103_p8 = scmp.lt.s32.totalorder %s1097_s8, %s1429_s6 }
 0xaa0   : > { %p1099_p3 = scmp.ne.s32.totalorder %s1097_s8, %s1098_s13  ;;  %p1104_p9 = scmp.lt.s32.totalorder %s1102_s16, %s1098_s13 }
 0xaa2   : > { %p1100_p4 = pnand %p1099_p3, %p1276_p5  ;;  %p1105_p10 = por %p1104_p9, %p1103_p8 }
 0xaa4   : > { %p1101_p7 = pneg %p1100_p4 }
 0xaa6   : > { %p1106_p11 = pnand %p1105_p10, %p1101_p7 }
 0xaa8   : > { %1109 = shalt.err (!%p1106_p11)
}
 0xaa9   : > { %920 = dma.vmem_to_hbm [thread:$0]  (%p1276_p5), %s762_s21, 128, %s764_s23, %s749_s29  }
 0xaaa   : > { %s1195_s9 = smov [#allocation11]   ;;  %s775_s20 = sshll.u32 %s1430_s7, 4  ;;  %s776_s20 = int_to_ptr.hbm [resolvable:$true] %s775_s20 }
 0xaab   : > { %s773_s22 = sshll.u32 %s1195_s9, 4  ;;  %s774_s22 = int_to_ptr.vmem [resolvable:$true] %s773_s22 }
 0xaac   : > { %922 = dma.vmem_to_hbm [thread:$0]  (%p178_p2), %s774_s22, 32, %s776_s20, [#allocation12]  }
 0xaad   : > { %1163 = dma.done.wait (%p178_p2), [#allocation12], 32  }
 0xaae   : > { %1165 = vsyncadd (%p178_p2), [#allocation12], 4294967264 }
 0xaaf PF: > { %p943_p5 = scmp.ge.s32.totalorder %s1184_s27, 2  ;;  %s792_s0 = sand.u32 1, %s1172_s24  }
 0xab0   : > { %s793_s11 = scalar_lea.sflag [#allocation7], %s792_s0 }
 0xab1   : > { %p934_p12 = pnand %p943_p5, %p1280_p6 }
 0xab3   : > { %p935_p13 = pneg %p934_p12 }
 0xab5   : > { %1167 = dma.done.wait (%p935_p13), %s793_s11, 128  }
 0xab6   : > { %1169 = vsyncadd (%p935_p13), %s793_s11, 4294967168  ;;  %p21_p0 = scmp.ge.s32.totalorder %s1261_s30, 4   ;;  %s1436_s24 = smov %s1176_s25 }
 0xab7   : > { %s1437_s25 = smov %s1180_s26  ;;  %s1438_s26 = smov %s1272_s10 }
 0xab8   : > { %s1439_s27 = smov %s1261_s30  ;;  %23 = sbr.rel (!%p21_p0) target bundleno = 8 (0x8), region = 113 }
 0xabd   :  { %799 = vsyncpa [#allocation6], 1 }
 0xabe   :  { %801 = vsyncpa [#allocation6 + $0x1], 1 }
 0xabf   :  { %802 = vsyncpa [#allocation9], 1 }
 0xac0   :  { %803 = vsyncpa [#allocation7], 1 }
 0xac1   :  { %805 = vsyncpa [#allocation7 + $0x1], 1 }
 0xac2   :  { %806 = vsyncpa [#allocation12], 1 }

</bundles_post_ra>
